<compile_context>
chip_gen: v7x
topology: tpu7x:2x2x1
jax: 0.10.0
libtpu: 0.0.40
codegen_flags: <defaults>
</compile_context>

<pallas_src>
import jax
import jax.numpy as jnp
from jax.experimental import pallas as pl
from jax.experimental.pallas import tpu as pltpu

CN_EPS = 1e-6  # ChannelNorm eps


# ----------------------------- Pallas kernel ------------------------------

def from_rgb_kernel(x_ref, p_ref, o_ref):
    """Fused 1x1 conv (3->C) + ChannelNorm for one (batch, pixel-tile) block.

    NCHW-native: channels on sublanes, pixels on lanes.
      x_ref: (1, 3, tp)   RGB rows for tp pixels of one image
      p_ref: (C, 8)       packed params: [w_r w_g w_b bias gamma beta 0 0]
      o_ref: (1, C, tp)
    """
    x = x_ref[0]                                   # (3, tp)
    p = p_ref[...]                                 # (C, 8)
    w0, w1, w2 = p[:, 0:1], p[:, 1:2], p[:, 2:3]   # (C, 1) conv weight columns
    b, g, beta = p[:, 3:4], p[:, 4:5], p[:, 5:6]   # (C, 1) bias / gamma / beta

    # 1x1 conv (3 -> C): three full-lane broadcast FMAs on the VPU.
    y = w0 * x[0:1, :] + w1 * x[1:2, :] + w2 * x[2:3, :] + b   # (C, tp)

    # ChannelNorm: per-pixel (per-lane) mean / biased variance over channels
    # (sublane axis), matching torch's mean(dim=1).
    m = jnp.mean(y, axis=0, keepdims=True)                      # (1, tp)
    s = jnp.mean((y - m) ** 2, axis=0, keepdims=True)           # (1, tp)
    y = (y - m) * jax.lax.rsqrt(s + CN_EPS)

    o_ref[0] = g * y + beta


# ----------------------------- wrapper / params ----------------------------

def init_params(key, channels=32):
    """Deterministic synthetic parameters matching FromRGB(channels)."""
    kw, kb = jax.random.split(key)
    scale = 1.0 / jnp.sqrt(3.0)  # fan_in = 3 (1x1 conv over RGB)
    return {
        # conv weight laid out as (C, 3)  == torch conv.weight[:, :, 0, 0]
        'w': jax.random.normal(kw, (channels, 3), jnp.float32) * scale,
        'b': jax.random.normal(kb, (channels,), jnp.float32) * scale,
        'g': jnp.ones((channels,), jnp.float32),      # ChannelNorm.weight
        'beta': jnp.zeros((channels,), jnp.float32),  # ChannelNorm.bias
    }


def from_rgb_forward(params, x_nchw, *, pixel_tile=8192):
    B, Cin, H, W = x_nchw.shape
    assert Cin == 3, "FromRGB expects 3 input channels"
    C = params['w'].shape[0]
    HW = H * W

    # Pixel-axis tile: lane-dense (multiple of 128) when tiling; if the whole
    # pixel axis fits the target, take it in one block (block == full dim is
    # always legal).  Non-divisible HW -> pl.cdiv grid with a ragged last
    # tile; the store is masked by Pallas and the norm is per-lane, so padded
    # lanes never affect real pixels.
    if HW <= pixel_tile:
        tp = HW
    else:
        tp = max(128, (pixel_tile // 128) * 128)
    grid = (B, pl.cdiv(HW, tp))

    # Free view of NCHW -- no relayout, no transpose.
    x_flat = x_nchw.reshape(B, 3, HW)

    # Single (C, 8) parameter slab: [w_r w_g w_b bias gamma beta pad pad].
    pslab = jnp.concatenate(
        [params['w'],
         params['b'][:, None],
         params['g'][:, None],
         params['beta'][:, None],
         jnp.zeros((C, 2), jnp.float32)], axis=1)

    cost = pl.CostEstimate(
        flops=12 * B * HW * C,                       # conv FMAs + norm arithmetic
        transcendentals=B * HW,                      # one rsqrt per pixel
        bytes_accessed=4 * (B * HW * (3 + C) + C * 8))

    out_flat = pl.pallas_call(
        from_rgb_kernel,
        out_shape=jax.ShapeDtypeStruct((B, C, HW), jnp.float32),
        grid=grid,
        in_specs=[
            pl.BlockSpec((1, 3, tp), lambda b, i: (b, 0, i)),   # RGB pixel tile
            pl.BlockSpec((C, 8), lambda b, i: (0, 0)),          # fused params
        ],
        out_specs=pl.BlockSpec((1, C, tp), lambda b, i: (b, 0, i)),
        compiler_params=pltpu.CompilerParams(
            dimension_semantics=("parallel", "parallel"),  # shards over v7x's 2 TCs
            vmem_limit_bytes=32 * 1024 * 1024),
        cost_estimate=cost,
    )(x_flat, pslab)

    # Free view back to NCHW.
    return out_flat.reshape(B, C, H, W)


# ----------------------------- pure-JAX reference --------------------------

def from_rgb_reference(params, x_nchw):
    y = jnp.einsum('bchw,dc->bdhw', x_nchw, params['w'])
    y = y + params['b'][None, :, None, None]
    m = jnp.mean(y, axis=1, keepdims=True)
    s = jnp.mean((y - m) ** 2, axis=1, keepdims=True)
    y = (y - m) * jax.lax.rsqrt(s + CN_EPS)
    return (params['g'][None, :, None, None] * y
            + params['beta'][None, :, None, None])


if __name__ == "__main__":
    key = jax.random.PRNGKey(0)
    pkey, xkey = jax.random.split(key)

    C = 32
    params = init_params(pkey, channels=C)
    x = jax.random.normal(xkey, (2, 3, 16, 16), jnp.float32)   # NCHW, like PyTorch

    fwd = jax.jit(from_rgb_forward)
    out = jax.block_until_ready(fwd(params, x))

    assert out.shape == (2, C, 16, 16) and out.dtype == jnp.float32
    ref = from_rgb_reference(params, x)
    assert jnp.allclose(out, ref, atol=1e-5, rtol=1e-5), "mismatch vs pure-JAX reference"
    print("KERNEL_OK")
</pallas_src>

<mosaic_0001>
module attributes {stable_mosaic.version = 11 : i64} {
  func.func @from_rgb_kernel(%arg0: i32, %arg1: i32, %arg2: memref<1x3x256xf32, #tpu.memory_space<vmem>>, %arg3: memref<32x8xf32, #tpu.memory_space<vmem>>, %arg4: memref<1x32x256xf32, #tpu.memory_space<vmem>>) attributes {dimension_semantics = [#tpu.dimension_semantics<parallel>, #tpu.dimension_semantics<parallel>], iteration_bounds = array<i64: 2, 1>, scalar_prefetch = 0 : i64, scratch_operands = 0 : i64, tpu.core_type = #tpu.core_type<tc>, window_params = [{transform_indices = @transform_0, window_bounds = array<i64: 1, 3, 256>}, {pipeline_mode = #tpu.pipeline_mode<synchronous>, transform_indices = @transform_1, window_bounds = array<i64: 32, 8>}, {transform_indices = @transform_2, window_bounds = array<i64: 1, 32, 256>}]} {
    %c0 = arith.constant 0 : index
    %c0_0 = arith.constant 0 : index
    %c0_1 = arith.constant 0 : index
    %0 = vector.load %arg2[%c0, %c0_0, %c0_1] : memref<1x3x256xf32, #tpu.memory_space<vmem>>, vector<1x3x256xf32>
    %1 = vector.shape_cast %0 : vector<1x3x256xf32> to vector<3x256xf32>
    %c0_2 = arith.constant 0 : index
    %c0_3 = arith.constant 0 : index
    %2 = vector.load %arg3[%c0_2, %c0_3] : memref<32x8xf32, #tpu.memory_space<vmem>>, vector<32x8xf32>
    %3 = vector.extract_strided_slice %2 {offsets = [0, 0], sizes = [32, 1], strides = [1, 1]} : vector<32x8xf32> to vector<32x1xf32>
    %4 = vector.extract_strided_slice %2 {offsets = [0, 1], sizes = [32, 1], strides = [1, 1]} : vector<32x8xf32> to vector<32x1xf32>
    %5 = vector.extract_strided_slice %2 {offsets = [0, 2], sizes = [32, 1], strides = [1, 1]} : vector<32x8xf32> to vector<32x1xf32>
    %6 = vector.extract_strided_slice %2 {offsets = [0, 3], sizes = [32, 1], strides = [1, 1]} : vector<32x8xf32> to vector<32x1xf32>
    %7 = vector.extract_strided_slice %2 {offsets = [0, 4], sizes = [32, 1], strides = [1, 1]} : vector<32x8xf32> to vector<32x1xf32>
    %8 = vector.extract_strided_slice %2 {offsets = [0, 5], sizes = [32, 1], strides = [1, 1]} : vector<32x8xf32> to vector<32x1xf32>
    %9 = vector.extract_strided_slice %1 {offsets = [0, 0], sizes = [1, 256], strides = [1, 1]} : vector<3x256xf32> to vector<1x256xf32>
    %10 = vector.broadcast %3 : vector<32x1xf32> to vector<32x256xf32>
    %11 = vector.broadcast %9 : vector<1x256xf32> to vector<32x256xf32>
    %12 = arith.mulf %10, %11 : vector<32x256xf32>
    %13 = vector.extract_strided_slice %1 {offsets = [1, 0], sizes = [1, 256], strides = [1, 1]} : vector<3x256xf32> to vector<1x256xf32>
    %14 = vector.broadcast %4 : vector<32x1xf32> to vector<32x256xf32>
    %15 = vector.broadcast %13 : vector<1x256xf32> to vector<32x256xf32>
    %16 = arith.mulf %14, %15 : vector<32x256xf32>
    %17 = arith.addf %12, %16 : vector<32x256xf32>
    %18 = vector.extract_strided_slice %1 {offsets = [2, 0], sizes = [1, 256], strides = [1, 1]} : vector<3x256xf32> to vector<1x256xf32>
    %19 = vector.broadcast %5 : vector<32x1xf32> to vector<32x256xf32>
    %20 = vector.broadcast %18 : vector<1x256xf32> to vector<32x256xf32>
    %21 = arith.mulf %19, %20 : vector<32x256xf32>
    %22 = arith.addf %17, %21 : vector<32x256xf32>
    %23 = vector.broadcast %6 : vector<32x1xf32> to vector<32x256xf32>
    %24 = arith.addf %22, %23 : vector<32x256xf32>
    %cst = arith.constant dense<0.000000e+00> : vector<256xf32>
    %25 = vector.multi_reduction <add>, %24, %cst [0] : vector<32x256xf32> to vector<256xf32>
    %26 = vector.shape_cast %25 : vector<256xf32> to vector<1x256xf32>
    %cst_4 = arith.constant 3.200000e+01 : f32
    %27 = vector.broadcast %cst_4 : f32 to vector<1x256xf32>
    %28 = arith.divf %26, %27 : vector<1x256xf32>
    %29 = vector.broadcast %28 : vector<1x256xf32> to vector<32x256xf32>
    %30 = arith.subf %24, %29 : vector<32x256xf32>
    %31 = arith.mulf %30, %30 : vector<32x256xf32>
    %cst_5 = arith.constant dense<0.000000e+00> : vector<256xf32>
    %32 = vector.multi_reduction <add>, %31, %cst_5 [0] : vector<32x256xf32> to vector<256xf32>
    %33 = vector.shape_cast %32 : vector<256xf32> to vector<1x256xf32>
    %cst_6 = arith.constant 3.200000e+01 : f32
    %34 = vector.broadcast %cst_6 : f32 to vector<1x256xf32>
    %35 = arith.divf %33, %34 : vector<1x256xf32>
    %36 = vector.broadcast %28 : vector<1x256xf32> to vector<32x256xf32>
    %37 = arith.subf %24, %36 : vector<32x256xf32>
    %cst_7 = arith.constant 9.99999997E-7 : f32
    %38 = vector.broadcast %cst_7 : f32 to vector<1x256xf32>
    %39 = arith.addf %35, %38 : vector<1x256xf32>
    %40 = math.rsqrt %39 : vector<1x256xf32>
    %41 = vector.broadcast %40 : vector<1x256xf32> to vector<32x256xf32>
    %42 = arith.mulf %37, %41 : vector<32x256xf32>
    %43 = vector.broadcast %7 : vector<32x1xf32> to vector<32x256xf32>
    %44 = arith.mulf %43, %42 : vector<32x256xf32>
    %45 = vector.broadcast %8 : vector<32x1xf32> to vector<32x256xf32>
    %46 = arith.addf %44, %45 : vector<32x256xf32>
    %c0_8 = arith.constant 0 : index
    %c0_9 = arith.constant 0 : index
    %c0_10 = arith.constant 0 : index
    %47 = vector.load %arg4[%c0_8, %c0_9, %c0_10] : memref<1x32x256xf32, #tpu.memory_space<vmem>>, vector<1x32x256xf32>
    %48 = vector.shape_cast %47 : vector<1x32x256xf32> to vector<32x256xf32>
    %49 = vector.shape_cast %46 : vector<32x256xf32> to vector<1x32x256xf32>
    tpu.vector_store %arg4[%c0_8, %c0_9, %c0_10], %49 {strides = array<i32>} : memref<1x32x256xf32, #tpu.memory_space<vmem>>, vector<1x32x256xf32>,
    return
  }
  func.func @transform_0(%arg0: i32, %arg1: i32) -> (i32, i32, i32) {
    %c0_i32 = arith.constant 0 : i32
    %c0_i32_0 = arith.constant 0 : i32
    return %arg0, %c0_i32, %arg1 : i32, i32, i32
  }
  func.func @transform_1(%arg0: i32, %arg1: i32) -> (i32, i32) {
    %c0_i32 = arith.constant 0 : i32
    %c0_i32_0 = arith.constant 0 : i32
    %c0_i32_1 = arith.constant 0 : i32
    return %c0_i32, %c0_i32_0 : i32, i32
  }
  func.func @transform_2(%arg0: i32, %arg1: i32) -> (i32, i32, i32) {
    %c0_i32 = arith.constant 0 : i32
    %c0_i32_0 = arith.constant 0 : i32
    return %arg0, %c0_i32, %arg1 : i32, i32, i32
  }
}

</mosaic_0001>

<bundles_post_ra>
// kernel: from_rgb_forward.1
= control target key start
LH: loop header
LB: loop body
LE: loop exit
PB: predicated region body
PF: predicated region fallthrough
CT: control target
= control target key end

     0   :  { %s676_s9 = smov 0   ;;  %s678_s10 = smov 0   ;;  %s729_s0 = inlined_call_operand.vmem [shape: f32[2,3,256], index: 0, kind: input, shape index: {}]   ;;  %s730_s1 = inlined_call_operand.vmem [shape: f32[32,8], index: 1, kind: input, shape index: {}]   ;;  %s731_s2 = inlined_call_operand.vmem [shape: f32[2,32,256], index: 2, kind: output, shape index: {}]  }
   0x1   :  { %s680_s11 = smov 0  }
   0x2 LB: > { %s24_s12 = sadd.s32 1, %s649_s10  ;;  %p575_p0 = scmp.ge.s32.totalorder %s653_s11, 1  ;;  %s653_s11 = sphi %s680_s11, %s12_s11   ;;  %s649_s10 = sphi %s678_s10, %s733_s10   ;;  %s645_s9 = sphi %s676_s9, %s732_s9  }
   0x3   : > { %p26_p1 = scmp.ge.s32.totalorder %s24_s12, 2  ;;  %p133_p2 = scmp.lt.s32.totalorder %s653_s11, 3 }
   0x5   : > { %s735_s12 = smov (%p26_p1, %s24_s12), 0  ;;  %p134_p3 = pnand %p575_p0, %p133_p2 }
   0x6   : > { %v184_v0 = vld [vmem:[%s730_s1] sm:$0xff] (!%p134_p3)  ;;  %v655_v1 = vmov (!%p134_p3), 1   ;;  %v656_v2 = vmov (!%p134_p3), 0   ;;  %v185_v3 = vld [vmem:[%s730_s1 + $0x8] sm:$0xff] (!%p134_p3)  ;;  %v186_v4 = vld [vmem:[%s730_s1 + $0x10] sm:$0xff] (!%p134_p3)  ;;  %v657_v5 = vmov (!%p134_p3), 2   ;;  %v209_v13 = vlaneseq (!%p134_p3) }
   0x7   : > { %137 = sbr.rel (%p134_p3) target bundleno = 240 (0xf0), region = 28  ;;  %615 = vset.pattern.permute.xlu1 (!%p134_p3), %v655_v1  ;;  %614 = vset.pattern.permute.xlu0 (!%p134_p3), %v656_v2  ;;  %v187_v6 = vld [vmem:[%s730_s1 + $0x18] sm:$0xff] (!%p134_p3)  ;;  %v658_v7 = vmov (!%p134_p3), 3   ;;  %v659_v8 = vmov (!%p134_p3), 4   ;;  %v660_v9 = vmov (!%p134_p3), 5   ;;  %p164_p4 = scmp.lt.s32.totalorder (!%p134_p3), %s645_s9, 1 }
   0x8   : > { %236 = vperm.xlu1 (!%p134_p3), %615, %v184_v0   ;;  %190 = vperm.xlu0 (!%p134_p3), %614, %v184_v0   ;;  %v210_v16 = vshrl.u32 (!%p134_p3), %v209_v13, 7 }
   0xa   : > { %v253_v17 = vsub.s32 (!%p134_p3), 1, %v210_v16  ;;  %v257_v18 = vsub.s32 (!%p134_p3), 5, %v210_v16  ;;  %v211_v19 = vsub.s32 (!%p134_p3), 0, %v210_v16  ;;  %v215_v20 = vsub.s32 (!%p134_p3), 4, %v210_v16 }
   0xb   : > { %v303_v24 = vsub.s32 (!%p134_p3), 2, %v210_v16  ;;  %v307_v25 = vsub.s32 (!%p134_p3), 6, %v210_v16 }
   0xc   : > { %240 = vperm.xlu1 (!%p134_p3), %615, %v185_v3   ;;  %195 = vperm.xlu0 (!%p134_p3), %614, %v185_v3  }
   0xe   : > { %s737_s9 = smov (!%p164_p4, %s645_s9), 1 }
   0xf   : > { %s582_s21 = sshll.u32 %s737_s9, 3  ;;  %s583_s25 = sshll.u32 %s737_s9, 6 }
  0x10   : > { %244 = vperm.xlu1 %615, %v186_v4   ;;  %200 = vperm.xlu0 %614, %v186_v4   ;;  %s171_s24 = scalar_lea.vmem %s729_s0, %s582_s21  ;;  %s181_s28 = scalar_lea.vmem %s731_s2, %s583_s25 }
  0x11   : > { %v183_v23 = vld [vmem:[%s171_s24] sm:$0x77] }
  0x12   : > { %v254_v26 = vrot.slane %v183_v23, %v253_v17  ;;  %v258_v27 = vrot.slane %v183_v23, %v257_v18  ;;  %v212_v28 = vrot.slane %v183_v23, %v211_v19  ;;  %v216_v29 = vrot.slane %v183_v23, %v215_v20 }
  0x13   : > { %v304_v30 = vrot.slane %v183_v23, %v303_v24  ;;  %v308_v31 = vrot.slane %v183_v23, %v307_v25 }
  0x14   : > { %617 = vset.pattern.permute.xlu1 %v657_v5  ;;  %616 = vset.pattern.permute.xlu0 %v657_v5  ;;  %v264_v34 = vrot.slane %v254_v26, %v253_v17  ;;  %v268_v35 = vrot.slane %v258_v27, %v253_v17  ;;  %v222_v36 = vrot.slane %v212_v28, %v211_v19 }
  0x15   : > { %290 = vperm.xlu1 %617, %v185_v3   ;;  %286 = vperm.xlu0 %616, %v184_v0   ;;  %v226_v37 = vrot.slane %v216_v29, %v211_v19  ;;  %v314_v38 = vrot.slane %v304_v30, %v303_v24  ;;  %v318_v39 = vrot.slane %v308_v31, %v303_v24 }
  0x19   : > { %618 = vset.pattern.permute.xlu1 %v656_v2  ;;  %619 = vset.pattern.permute.xlu0 %v655_v1 }
  0x1a   : > { %205 = vperm.xlu1 %618, %v187_v6   ;;  %248 = vperm.xlu0 %619, %v187_v6  }
  0x1e   : > { %620 = vset.pattern.permute.xlu1 %v657_v5  ;;  %621 = vset.pattern.permute.xlu0 %v658_v7 }
  0x1f   : > { %294 = vperm.xlu1 %620, %v186_v4   ;;  %336 = vperm.xlu0 %621, %v184_v0  }
  0x23   : > { %298 = vperm.xlu1 %620, %v187_v6   ;;  %348 = vperm.xlu0 %621, %v187_v6  }
  0x27   : > { %622 = vset.pattern.permute.xlu1 %v658_v7  ;;  %624 = vset.pattern.permute.xlu0 %v659_v8 }
  0x28   : > { %340 = vperm.xlu1 %622, %v185_v3   ;;  %433 = vperm.xlu0 %624, %v185_v3  }
  0x2c   : > { %344 = vperm.xlu1 %622, %v186_v4   ;;  %625 = vset.pattern.permute.xlu0 %v660_v9 }
  0x2d   : > { %453 = vperm.xlu0 %625, %v184_v0  }
  0x30   : > { %623 = vset.pattern.permute.xlu1 %v659_v8 }
  0x31   : > { %429 = vperm.xlu1 %623, %v184_v0   ;;  %465 = vperm.xlu0 %625, %v187_v6  }
  0x35   : > { %437 = vperm.xlu1 %623, %v186_v4  }
  0x39   : > { %441 = vperm.xlu1 %623, %v187_v6  }
  0x3d   : > { %626 = vset.pattern.permute.xlu1 %v660_v9 }
  0x3e   : > { %457 = vperm.xlu1 %626, %v185_v3  }
  0x42   : > { %461 = vperm.xlu1 %626, %v186_v4  }
  0x87   : > { %v237_v10 = vpop.permute.xlu1 %236  ;;  %v191_v11 = vpop.permute.xlu0 %190 }
  0x88   : > { %v269_v45 = vmul.f32 %v264_v34, %v237_v10  ;;  %v270_v46 = vmul.f32 %v268_v35, %v237_v10  ;;  %v227_v48 = vmul.f32 %v222_v36, %v191_v11  ;;  %v228_v49 = vmul.f32 %v226_v37, %v191_v11 }
  0x8a   : > { %v277_v1 = vadd.f32 %v269_v45, %v227_v48  ;;  %v278_v2 = vadd.f32 %v270_v46, %v228_v49 }
  0x8b   : > { %v241_v12 = vpop.permute.xlu1 %240  ;;  %v196_v14 = vpop.permute.xlu0 %195 }
  0x8c   : > { %v271_v40 = vmul.f32 %v264_v34, %v241_v12  ;;  %v272_v41 = vmul.f32 %v268_v35, %v241_v12  ;;  %v229_v42 = vmul.f32 %v222_v36, %v196_v14  ;;  %v230_v43 = vmul.f32 %v226_v37, %v196_v14 }
  0x8e   : > { %v279_v52 = vadd.f32 %v271_v40, %v229_v42  ;;  %v280_v53 = vadd.f32 %v272_v41, %v230_v43 }
  0x8f   : > { %v245_v15 = vpop.permute.xlu1 %244  ;;  %v201_v21 = vpop.permute.xlu0 %200 }
  0x90   : > { %v273_v54 = vmul.f32 %v264_v34, %v245_v15  ;;  %v274_v55 = vmul.f32 %v268_v35, %v245_v15  ;;  %v231_v57 = vmul.f32 %v222_v36, %v201_v21  ;;  %v232_v58 = vmul.f32 %v226_v37, %v201_v21 }
  0x92   : > { %v281_v10 = vadd.f32 %v273_v54, %v231_v57  ;;  %v282_v11 = vadd.f32 %v274_v55, %v232_v58 }
  0x94   : > { %v291_v22 = vpop.permute.xlu1 %290  ;;  %v287_v33 = vpop.permute.xlu0 %286 }
  0x95   : > { %v321_v50 = vmul.f32 %v314_v38, %v291_v22  ;;  %v322_v51 = vmul.f32 %v318_v39, %v291_v22  ;;  %v319_v59 = vmul.f32 %v314_v38, %v287_v33  ;;  %v320_v60 = vmul.f32 %v318_v39, %v287_v33 }
  0x97   : > { %v329_v3 = vadd.f32 %v321_v50, %v279_v52  ;;  %v330_v4 = vadd.f32 %v322_v51, %v280_v53  ;;  %v327_v12 = vadd.f32 %v319_v59, %v277_v1  ;;  %v328_v13 = vadd.f32 %v320_v60, %v278_v2 }
  0x99   : > { %v206_v32 = vpop.permute.xlu1 %205  ;;  %v249_v47 = vpop.permute.xlu0 %248 }
  0x9a   : > { %v233_v61 = vmul.f32 %v222_v36, %v206_v32  ;;  %v234_v62 = vmul.f32 %v226_v37, %v206_v32  ;;  %v275_v63 = vmul.f32 %v264_v34, %v249_v47  ;;  %v276_v0 = vmul.f32 %v268_v35, %v249_v47 }
  0x9c   : > { %v283_v15 = vadd.f32 %v275_v63, %v233_v61  ;;  %v284_v16 = vadd.f32 %v276_v0, %v234_v62 }
  0x9e   : > { %v295_v44 = vpop.permute.xlu1 %294  ;;  %v337_v7 = vpop.permute.xlu0 %336 }
  0x9f   : > { %v323_v5 = vmul.f32 %v314_v38, %v295_v44  ;;  %v324_v6 = vmul.f32 %v318_v39, %v295_v44  ;;  %v351_v19 = vadd.f32 %v337_v7, %v327_v12  ;;  %v352_v20 = vadd.f32 %v337_v7, %v328_v13 }
  0xa1   : > { %v331_v23 = vadd.f32 %v323_v5, %v281_v10  ;;  %v332_v24 = vadd.f32 %v324_v6, %v282_v11 }
  0xa2   : > { %v299_v56 = vpop.permute.xlu1 %298  ;;  %v349_v25 = vpop.permute.xlu0 %348 }
  0xa3   : > { %v325_v8 = vmul.f32 %v314_v38, %v299_v56  ;;  %v326_v9 = vmul.f32 %v318_v39, %v299_v56 }
  0xa5   : > { %v333_v21 = vadd.f32 %v325_v8, %v283_v15  ;;  %v334_v22 = vadd.f32 %v326_v9, %v284_v16 }
  0xa7   : > { %v341_v14 = vpop.permute.xlu1 %340  ;;  %v357_v31 = vadd.f32 %v349_v25, %v333_v21  ;;  %v358_v32 = vadd.f32 %v349_v25, %v334_v22 }
  0xa8   : > { %v353_v17 = vadd.f32 %v341_v14, %v329_v3  ;;  %v354_v18 = vadd.f32 %v341_v14, %v330_v4 }
  0xaa   : > { %v359_v27 = vadd.f32 %v353_v17, %v351_v19  ;;  %v368_v28 = vadd.f32 %v354_v18, %v352_v20 }
  0xab   : > { %v345_v26 = vpop.permute.xlu1 %344 }
  0xac   : > { %v355_v29 = vadd.f32 %v345_v26, %v331_v23  ;;  %v356_v30 = vadd.f32 %v345_v26, %v332_v24 }
  0xae   : > { %v360_v33 = vadd.f32 %v359_v27, %v355_v29  ;;  %v369_v34 = vadd.f32 %v368_v28, %v356_v30  ;;  %v434_v27 = vpop.permute.xlu0 %433 }
  0xb0   : > { %v361_v35 = vadd.f32 %v360_v33, %v357_v31  ;;  %v370_v36 = vadd.f32 %v369_v34, %v358_v32 }
  0xb2   : > { %v362_v37 = vrot.slane %v361_v35, 4  ;;  %v371_v38 = vrot.slane %v370_v36, 4 }
  0xb4   : > { %v363_v39 = vadd.f32 %v362_v37, %v361_v35  ;;  %v372_v40 = vadd.f32 %v371_v38, %v370_v36 }
  0xb6   : > { %v364_v41 = vrot.slane %v363_v39, 2  ;;  %v373_v42 = vrot.slane %v372_v40, 2 }
  0xb8   : > { %v365_v43 = vadd.f32 %v364_v41, %v363_v39  ;;  %v374_v44 = vadd.f32 %v373_v42, %v372_v40 }
  0xba   : > { %v366_v45 = vrot.slane %v365_v43, 1  ;;  %v375_v46 = vrot.slane %v374_v44, 1 }
  0xbc   : > { %v367_v47 = vadd.f32 %v366_v45, %v365_v43  ;;  %v376_v48 = vadd.f32 %v375_v46, %v374_v44 }
  0xbe   : > { %v378_v49 = vmul.f32 0.03125, %v367_v47  ;;  %v379_v50 = vmul.f32 0.03125, %v376_v48 }
  0xc0   : > { %v384_v51 = vsub.f32 %v355_v29, %v378_v49  ;;  %v385_v52 = vsub.f32 %v356_v30, %v379_v50  ;;  %v380_v53 = vsub.f32 %v351_v19, %v378_v49  ;;  %v381_v54 = vsub.f32 %v352_v20, %v379_v50  ;;  %v454_v30 = vpop.permute.xlu0 %453 }
  0xc1   : > { %v382_v55 = vsub.f32 %v353_v17, %v378_v49  ;;  %v383_v56 = vsub.f32 %v354_v18, %v379_v50  ;;  %v386_v57 = vsub.f32 %v357_v31, %v378_v49  ;;  %v387_v58 = vsub.f32 %v358_v32, %v379_v50  ;;  %v430_v17 = vpop.permute.xlu1 %429 }
  0xc2   : > { %v388_v59 = vmul.f32 %v380_v53, %v380_v53  ;;  %v389_v60 = vmul.f32 %v381_v54, %v381_v54  ;;  %v392_v63 = vmul.f32 %v384_v51, %v384_v51  ;;  %v393_v0 = vmul.f32 %v385_v52, %v385_v52 }
  0xc3   : > { %v390_v61 = vmul.f32 %v382_v55, %v382_v55  ;;  %v391_v62 = vmul.f32 %v383_v56, %v383_v56  ;;  %v394_v3 = vmul.f32 %v386_v57, %v386_v57  ;;  %v395_v4 = vmul.f32 %v387_v58, %v387_v58 }
  0xc4   : > { %v466_v50 = vpop.permute.xlu0 %465 }
  0xc5   : > { %v396_v1 = vadd.f32 %v390_v61, %v388_v59  ;;  %v405_v2 = vadd.f32 %v391_v62, %v389_v60  ;;  %v438_v26 = vpop.permute.xlu1 %437 }
  0xc7   : > { %v397_v5 = vadd.f32 %v396_v1, %v392_v63  ;;  %v406_v6 = vadd.f32 %v405_v2, %v393_v0 }
  0xc9   : > { %v398_v7 = vadd.f32 %v397_v5, %v394_v3  ;;  %v407_v8 = vadd.f32 %v406_v6, %v395_v4  ;;  %v442_v28 = vpop.permute.xlu1 %441 }
  0xcb   : > { %v399_v9 = vrot.slane %v398_v7, 4  ;;  %v408_v10 = vrot.slane %v407_v8, 4 }
  0xcd   : > { %v400_v11 = vadd.f32 %v399_v9, %v398_v7  ;;  %v409_v12 = vadd.f32 %v408_v10, %v407_v8  ;;  %v458_v29 = vpop.permute.xlu1 %457 }
  0xcf   : > { %v401_v13 = vrot.slane %v400_v11, 2  ;;  %v410_v14 = vrot.slane %v409_v12, 2 }
  0xd1   : > { %v402_v15 = vadd.f32 %v401_v13, %v400_v11  ;;  %v411_v16 = vadd.f32 %v410_v14, %v409_v12  ;;  %v462_v49 = vpop.permute.xlu1 %461 }
  0xd3   : > { %v403_v18 = vrot.slane %v402_v15, 1  ;;  %v412_v19 = vrot.slane %v411_v16, 1 }
  0xd5   : > { %v404_v20 = vadd.f32 %v403_v18, %v402_v15  ;;  %v413_v21 = vadd.f32 %v412_v19, %v411_v16 }
  0xd7   : > { %v414_v22 = vmul.f32 0.03125, %v404_v20  ;;  %v415_v23 = vmul.f32 0.03125, %v413_v21 }
  0xd9   : > { %v416_v24 = vadd.f32 1e-06, %v414_v22  ;;  %v417_v25 = vadd.f32 1e-06, %v415_v23 }
  0xdb   : > { %627 = vrsqrt.f32 %v416_v24 }
  0xdc   : > { %629 = vrsqrt.f32 %v417_v25 }
  0xe5   : > { %v628_v31 = vpop.eup %627 }
  0xe6   : > { %v630_v32 = vpop.eup %629  ;;  %v420_v33 = vmul.f32 %v628_v31, %v380_v53  ;;  %v424_v34 = vmul.f32 %v628_v31, %v384_v51  ;;  %v426_v35 = vmul.f32 %v628_v31, %v386_v57  ;;  %v422_v36 = vmul.f32 %v628_v31, %v382_v55 }
  0xe7   : > { %v421_v37 = vmul.f32 %v630_v32, %v381_v54  ;;  %v425_v38 = vmul.f32 %v630_v32, %v385_v52  ;;  %v427_v39 = vmul.f32 %v630_v32, %v387_v58  ;;  %v423_v40 = vmul.f32 %v630_v32, %v383_v56 }
  0xe8   : > { %v444_v41 = vmul.f32 %v430_v17, %v420_v33  ;;  %v448_v42 = vmul.f32 %v438_v26, %v424_v34  ;;  %v450_v43 = vmul.f32 %v442_v28, %v426_v35  ;;  %v446_v44 = vmul.f32 %v434_v27, %v422_v36 }
  0xe9   : > { %v445_v45 = vmul.f32 %v430_v17, %v421_v37  ;;  %v449_v46 = vmul.f32 %v438_v26, %v425_v38  ;;  %v451_v47 = vmul.f32 %v442_v28, %v427_v39  ;;  %v447_v48 = vmul.f32 %v434_v27, %v423_v40 }
  0xea   : > { %v470_v51 = vadd.f32 %v458_v29, %v446_v44  ;;  %v468_v53 = vadd.f32 %v454_v30, %v444_v41  ;;  %v472_v54 = vadd.f32 %v462_v49, %v448_v42  ;;  %v474_v52 = vadd.f32 %v466_v50, %v450_v43 }
  0xeb   : > { %v471_v55 = vadd.f32 %v458_v29, %v447_v48  ;;  %v469_v56 = vadd.f32 %v454_v30, %v445_v45  ;;  %v473_v57 = vadd.f32 %v462_v49, %v449_v46  ;;  %v475_v58 = vadd.f32 %v466_v50, %v451_v47 }
  0xec   : > { %478 = vst [vmem:[%s181_s28 + $0x10] sm:$0xff] %v470_v51  ;;  %476 = vst [vmem:[%s181_s28] sm:$0xff] %v468_v53 }
  0xed   : > { %480 = vst [vmem:[%s181_s28 + $0x20] sm:$0xff] %v472_v54  ;;  %482 = vst [vmem:[%s181_s28 + $0x30] sm:$0xff] %v474_v52 }
  0xee   : > { %479 = vst [vmem:[%s181_s28 + $0x18] sm:$0xff] %v471_v55  ;;  %477 = vst [vmem:[%s181_s28 + $0x8] sm:$0xff] %v469_v56 }
  0xef   : > { %481 = vst [vmem:[%s181_s28 + $0x28] sm:$0xff] %v473_v57  ;;  %483 = vst [vmem:[%s181_s28 + $0x38] sm:$0xff] %v475_v58 }
  0xf0 PF: > { %s12_s11 = sadd.s32 1, %s653_s11   ;;  %s732_s9 = smov %s649_s10 }
  0xf1   : > { %p9_p5 = scmp.ge.s32.totalorder %s12_s11, 4   ;;  %s733_s10 = smov %s735_s12 }
  0xf3   :  { %11 = sbr.rel (!%p9_p5) target bundleno = 2 (0x2), region = 58 }

</bundles_post_ra>
